<compile_context>
chip_gen: v7x
topology: tpu7x:2x2x1
jax: 0.10.0
libtpu: 0.0.40
codegen_flags: <defaults>
</compile_context>

<pallas_src>
import functools
import math

import jax
import jax.numpy as jnp
from jax import lax
from jax.experimental import pallas as pl
from jax.experimental.pallas import tpu as pltpu


def _round_up(v, m):
    return ((v + m - 1) // m) * m


def _mse_kernel(x_ref, y_ref, o_ref, acc_ref, *, inv_n, n_total, tile_n,
                acc_w, chunks, k_per_split, needs_mask):
    """One (split, batch-block, N-chunk) grid step.

    x_ref, y_ref: (tile_b, tile_n) input tiles
    o_ref:        (1, tile_b, 1) per-sample partial means (written at last k)
    acc_ref:      (tile_b, acc_w) f32 running partial sums (VMEM scratch)
    """
    s = pl.program_id(0)
    k = pl.program_id(2)

    @pl.when(k == 0)
    def _init():
        acc_ref[...] = jnp.zeros_like(acc_ref)

    # Column offset of this tile on the logical (unclamped) N axis.
    kg = s * k_per_split + k
    tile_base = kg * tile_n

    def chunk_sq(col0, xc, yc):
        d = xc.astype(jnp.float32) - yc.astype(jnp.float32)
        d2 = d * d
        if needs_mask:
            col = tile_base + col0 + lax.broadcasted_iota(jnp.int32, d2.shape, 1)
            d2 = jnp.where(col < n_total, d2, 0.0)
        return d2

    if chunks <= 8:
        # Fully unrolled, static ref slices (zero-cost views).
        acc = acc_ref[...]
        for c in range(chunks):
            off = c * acc_w
            acc = acc + chunk_sq(off,
                                 x_ref[:, off:off + acc_w],
                                 y_ref[:, off:off + acc_w])
        acc_ref[...] = acc
    else:
        def body(c, acc):
            off = pl.multiple_of(c * acc_w, acc_w)
            return acc + chunk_sq(off,
                                  x_ref[:, pl.ds(off, acc_w)],
                                  y_ref[:, pl.ds(off, acc_w)])
        acc_ref[...] = lax.fori_loop(0, chunks, body, acc_ref[...], unroll=4)

    @pl.when(k == pl.num_programs(2) - 1)
    def _finalize():
        # Single cross-lane (XLU) reduce per batch block, scale by 1/N.
        total = jnp.sum(acc_ref[...], axis=-1, keepdims=True)   # (tile_b, 1)
        o_ref[0] = (total * jnp.float32(inv_n)).astype(o_ref.dtype)


def _vmem_capacity_bytes():
    try:
        return int(pltpu.get_tpu_info().vmem_capacity_bytes)
    except Exception:
        return 64 << 20   # conservative (v7x-sized) fallback


def per_sample_mse(x, y):
    """x, y: (B, ...) -> (B,) float32 where out[i] = mean((x[i]-y[i])**2)."""
    assert x.shape == y.shape, "input/target must have the same shape"
    b = x.shape[0]
    n = int(math.prod(x.shape[1:]))

    if b == 0:
        return jnp.zeros((0,), jnp.float32)
    if n == 0:
        # mean over an empty tensor is NaN (matches torch semantics).
        return jnp.full((b,), jnp.nan, jnp.float32)

    x2 = x.reshape(b, n)
    y2 = y.reshape(b, n)

    itemsize = max(jnp.dtype(x2.dtype).itemsize, jnp.dtype(y2.dtype).itemsize)
    pack = {4: 8, 2: 16, 1: 32}.get(itemsize, 8)   # native sublane pack

    # ---- tile selection: target a few MiB of input per grid step ----------
    vmem_cap = _vmem_capacity_bytes()
    tile_budget = (4 << 20) if vmem_cap <= (64 << 20) else (8 << 20)  # per input
    vmem_limit = min(64 << 20, max(32 << 20, vmem_cap // 2))

    tile_n_full = _round_up(n, 128)
    tile_b = b if b <= pack else pack
    max_n = max(128, (tile_budget // (tile_b * itemsize)) // 128 * 128)
    tile_n = min(tile_n_full, max_n)

    if tile_n == tile_n_full and b > tile_b:
        # N fits in a single tile; spend remaining budget on the batch axis
        # (capped so the per-chunk working set stays register-resident).
        afford_b = tile_budget // (tile_n * itemsize)
        tile_b = min(64, max(pack, (afford_b // pack) * pack),
                     _round_up(b, pack))

    # Accumulator lane width: multiple of 128 dividing tile_n, small enough to
    # keep the (tile_b, acc_w) chunk in registers.
    acc_w = 128
    for cand in (1024, 512, 256):
        if tile_n % cand == 0 and tile_b * cand <= 8192:
            acc_w = cand
            break
    chunks = tile_n // acc_w

    grid_b = pl.cdiv(b, tile_b)
    k_steps = pl.cdiv(n, tile_n)
    # Split the N range across a leading parallel axis when the batch axis
    # alone cannot occupy both TensorCores (v7x). Harmless on 1-TC chips.
    s_split = 2 if (grid_b == 1 and k_steps >= 2) else 1
    k_per_split = pl.cdiv(k_steps, s_split)

    b_up = grid_b * tile_b
    needs_mask = (s_split * k_per_split * tile_n) > n

    if s_split * k_per_split == k_steps:
        def in_idx(s, i, k):
            return (i, s * k_per_split + k)
    else:
        last_blk = k_steps - 1

        def in_idx(s, i, k):
            # Clamp duplicated tail blocks; the kernel masks them to zero.
            return (i, jnp.minimum(s * k_per_split + k, last_blk))

    kernel = functools.partial(
        _mse_kernel, inv_n=1.0 / float(n), n_total=n, tile_n=tile_n,
        acc_w=acc_w, chunks=chunks, k_per_split=k_per_split,
        needs_mask=needs_mask)

    bytes_in = jnp.dtype(x2.dtype).itemsize + jnp.dtype(y2.dtype).itemsize

    partial = pl.pallas_call(
        kernel,
        out_shape=jax.ShapeDtypeStruct((s_split, b_up, 1), jnp.float32),
        grid_spec=pltpu.PrefetchScalarGridSpec(
            num_scalar_prefetch=0,
            grid=(s_split, grid_b, k_per_split),
            in_specs=[
                pl.BlockSpec((tile_b, tile_n), in_idx),
                pl.BlockSpec((tile_b, tile_n), in_idx),
            ],
            out_specs=pl.BlockSpec((1, tile_b, 1), lambda s, i, k: (s, i, 0)),
            scratch_shapes=[pltpu.VMEM((tile_b, acc_w), jnp.float32)],
        ),
        compiler_params=pltpu.CompilerParams(
            dimension_semantics=("parallel", "parallel", "arbitrary"),
            vmem_limit_bytes=vmem_limit,
        ),
        cost_estimate=pl.CostEstimate(
            flops=3 * b * n,
            transcendentals=0,
            bytes_accessed=b * n * bytes_in + b * 4,
        ),
    )(x2, y2)

    # Sum N-split partials (s_split == 1 in the common case); drop padded rows.
    return jnp.sum(partial[:, :b, 0], axis=0)


if __name__ == "__main__":
    key = jax.random.PRNGKey(0)
    k1, k2 = jax.random.split(key)
    # Small NCHW shapes consistent with the module's forward.
    B, C, H, W = 2, 4, 16, 16
    x = jax.random.normal(k1, (B, C, H, W), dtype=jnp.float32)
    t = jax.random.normal(k2, (B, C, H, W), dtype=jnp.float32)

    out = per_sample_mse(x, t)
    out = jax.block_until_ready(out)

    # Reference check mirroring torch.nn.MSELoss applied per sample.
    ref = jnp.mean((x.reshape(B, -1) - t.reshape(B, -1)) ** 2, axis=-1)
    assert out.shape == (B,)
    assert jnp.allclose(out, ref, rtol=1e-5, atol=1e-6), (out, ref)

    print("KERNEL_OK")
</pallas_src>

<mosaic_0001>
module attributes {stable_mosaic.version = 11 : i64} {
  func.func @_mse_kernel(%arg0: i32, %arg1: i32, %arg2: i32, %arg3: memref<2x1024xf32, #tpu.memory_space<vmem>>, %arg4: memref<2x1024xf32, #tpu.memory_space<vmem>>, %arg5: memref<1x2x1xf32, #tpu.memory_space<vmem>>, %arg6: memref<2x1024xf32, #tpu.memory_space<vmem>>) attributes {dimension_semantics = [#tpu.dimension_semantics<parallel>, #tpu.dimension_semantics<parallel>, #tpu.dimension_semantics<arbitrary>], iteration_bounds = array<i64: 1, 1, 1>, scalar_prefetch = 0 : i64, scratch_operands = 1 : i64, tpu.core_type = #tpu.core_type<tc>, window_params = [{transform_indices = @transform_0, window_bounds = array<i64: 2, 1024>}, {transform_indices = @transform_1, window_bounds = array<i64: 2, 1024>}, {transform_indices = @transform_2, window_bounds = array<i64: 1, 2, 1>}]} {
    %c0_i32 = arith.constant 0 : i32
    %0 = arith.cmpi eq, %arg2, %c0_i32 : i32
    %1 = arith.extui %0 : i1 to i32
    %c0_i32_0 = arith.constant 0 : i32
    %2 = arith.cmpi ne, %1, %c0_i32_0 : i32
    scf.if %2 {
      %cst = arith.constant 0.000000e+00 : f32
      %13 = vector.broadcast %cst : f32 to vector<2x1024xf32>
      %c0_10 = arith.constant 0 : index
      %c0_11 = arith.constant 0 : index
      %14 = vector.load %arg6[%c0_10, %c0_11] : memref<2x1024xf32, #tpu.memory_space<vmem>>, vector<2x1024xf32>
      tpu.vector_store %arg6[%c0_10, %c0_11], %13 {strides = array<i32>} : memref<2x1024xf32, #tpu.memory_space<vmem>>, vector<2x1024xf32>,
    } else {
    }
    %c0 = arith.constant 0 : index
    %c0_1 = arith.constant 0 : index
    %3 = vector.load %arg6[%c0, %c0_1] : memref<2x1024xf32, #tpu.memory_space<vmem>>, vector<2x1024xf32>
    %c0_2 = arith.constant 0 : index
    %c0_3 = arith.constant 0 : index
    %4 = vector.load %arg3[%c0_2, %c0_3] : memref<2x1024xf32, #tpu.memory_space<vmem>>, vector<2x1024xf32>
    %c0_4 = arith.constant 0 : index
    %c0_5 = arith.constant 0 : index
    %5 = vector.load %arg4[%c0_4, %c0_5] : memref<2x1024xf32, #tpu.memory_space<vmem>>, vector<2x1024xf32>
    %6 = arith.subf %4, %5 : vector<2x1024xf32>
    %7 = arith.mulf %6, %6 : vector<2x1024xf32>
    %8 = arith.addf %3, %7 : vector<2x1024xf32>
    %c0_6 = arith.constant 0 : index
    %c0_7 = arith.constant 0 : index
    %9 = vector.load %arg6[%c0_6, %c0_7] : memref<2x1024xf32, #tpu.memory_space<vmem>>, vector<2x1024xf32>
    tpu.vector_store %arg6[%c0_6, %c0_7], %8 {strides = array<i32>} : memref<2x1024xf32, #tpu.memory_space<vmem>>, vector<2x1024xf32>,
    %c0_i32_8 = arith.constant 0 : i32
    %10 = arith.cmpi eq, %arg2, %c0_i32_8 : i32
    %11 = arith.extui %10 : i1 to i32
    %c0_i32_9 = arith.constant 0 : i32
    %12 = arith.cmpi ne, %11, %c0_i32_9 : i32
    scf.if %12 {
      %c0_10 = arith.constant 0 : index
      %c0_11 = arith.constant 0 : index
      %13 = vector.load %arg6[%c0_10, %c0_11] : memref<2x1024xf32, #tpu.memory_space<vmem>>, vector<2x1024xf32>
      %cst = arith.constant dense<0.000000e+00> : vector<2xf32>
      %14 = vector.multi_reduction <add>, %13, %cst [1] : vector<2x1024xf32> to vector<2xf32>
      %15 = vector.shape_cast %14 : vector<2xf32> to vector<2x1xf32>
      %cst_12 = arith.constant 9.765625E-4 : f32
      %16 = vector.broadcast %cst_12 : f32 to vector<2x1xf32>
      %17 = arith.mulf %15, %16 : vector<2x1xf32>
      %c0_13 = arith.constant 0 : index
      %c0_14 = arith.constant 0 : index
      %c0_15 = arith.constant 0 : index
      %18 = vector.load %arg5[%c0_13, %c0_14, %c0_15] : memref<1x2x1xf32, #tpu.memory_space<vmem>>, vector<1x2x1xf32>
      %19 = vector.shape_cast %18 : vector<1x2x1xf32> to vector<2x1xf32>
      %20 = vector.shape_cast %17 : vector<2x1xf32> to vector<1x2x1xf32>
      tpu.vector_store %arg5[%c0_13, %c0_14, %c0_15], %20 {strides = array<i32>} : memref<1x2x1xf32, #tpu.memory_space<vmem>>, vector<1x2x1xf32>,
    } else {
    }
    return
  }
  func.func @transform_0(%arg0: i32, %arg1: i32, %arg2: i32) -> (i32, i32) {
    %c1_i32 = arith.constant 1 : i32
    %0 = arith.muli %arg0, %c1_i32 : i32
    %1 = arith.addi %0, %arg2 : i32
    %c0_i32 = arith.constant 0 : i32
    return %arg1, %1 : i32, i32
  }
  func.func @transform_1(%arg0: i32, %arg1: i32, %arg2: i32) -> (i32, i32) {
    %c1_i32 = arith.constant 1 : i32
    %0 = arith.muli %arg0, %c1_i32 : i32
    %1 = arith.addi %0, %arg2 : i32
    %c0_i32 = arith.constant 0 : i32
    return %arg1, %1 : i32, i32
  }
  func.func @transform_2(%arg0: i32, %arg1: i32, %arg2: i32) -> (i32, i32, i32) {
    %c0_i32 = arith.constant 0 : i32
    %c0_i32_0 = arith.constant 0 : i32
    return %arg0, %arg1, %c0_i32 : i32, i32, i32
  }
}

</mosaic_0001>

<bundles_post_ra>
// kernel: tpu_custom_call.1
= control target key start
LH: loop header
LB: loop body
LE: loop exit
PB: predicated region body
PF: predicated region fallthrough
CT: control target
= control target key end

     0   :  { %7 = vsyncpa [#allocation4], 0  ;;  %s247_s0 = inlined_call_operand.hbm [shape: f32[2,1024], index: 0, kind: input, shape index: {}]   ;;  %s248_s1 = inlined_call_operand.hbm [shape: f32[2,1024], index: 1, kind: input, shape index: {}]   ;;  %s249_s2 = inlined_call_operand.vmem [shape: f32[1,2,1], index: 2, kind: output, shape index: {}]  }
   0x1   :  { %8 = vsyncpa [#allocation6], 0  ;;  %s194_s9 = smov [#allocation3]   ;;  %s195_s11 = smov [#allocation5]  }
   0x2   :  { %s19_s10 = sshll.u32 %s194_s9, 4  ;;  %s33_s12 = sshll.u32 %s195_s11, 4  ;;  %s20_s10 = int_to_ptr.vmem [resolvable:$true] %s19_s10  ;;  %s34_s12 = int_to_ptr.vmem [resolvable:$true] %s33_s12 }
   0x3   :  { %s146_s15 = scalar_lea.hbm %s247_s0, 256 }
   0x4   :  { %p147_p0 = scmp.ne.s32.totalorder %s247_s0, %s146_s15  ;;  %p150_p1 = scmp.lt.u32.totalorder %s146_s15, %s247_s0 }
   0x6   :  { %p152_p2 = pnand %p150_p1, %p147_p0 }
   0x8   :  { %155 = shalt.err (!%p152_p2)
}
   0x9   :  { %s156_s20 = scalar_lea.vmem %s20_s10, 256  ;;  %p161_p4 = scmp.lt.s32.totalorder %s20_s10, %s20_s10 }
   0xa   :  { %p157_p3 = scmp.ne.s32.totalorder %s20_s10, %s156_s20  ;;  %p162_p5 = scmp.lt.s32.totalorder %s156_s20, %s156_s20 }
   0xc   :  { %p163_p6 = por %p162_p5, %p161_p4 }
   0xe   :  { %p164_p7 = pnand %p163_p6, %p157_p3 }
  0x10   :  { %167 = shalt.err (!%p164_p7)
}
  0x11   :  { %22 = dma.hbm_to_vmem [thread:$0]  %s247_s0, 256, %s20_s10, [#allocation4]  }
  0x12   :  { %s168_s25 = scalar_lea.hbm %s248_s1, 256 }
  0x13   :  { %p169_p8 = scmp.ne.s32.totalorder %s248_s1, %s168_s25  ;;  %p172_p9 = scmp.lt.u32.totalorder %s168_s25, %s248_s1 }
  0x15   :  { %p174_p10 = pnand %p172_p9, %p169_p8 }
  0x17   :  { %177 = shalt.err (!%p174_p10)
}
  0x18   :  { %s178_s30 = scalar_lea.vmem %s34_s12, 256  ;;  %p183_p12 = scmp.lt.s32.totalorder %s34_s12, %s34_s12 }
  0x19   :  { %p179_p11 = scmp.ne.s32.totalorder %s34_s12, %s178_s30  ;;  %p184_p13 = scmp.lt.s32.totalorder %s178_s30, %s178_s30 }
  0x1b   :  { %p185_p0 = por %p184_p13, %p183_p12 }
  0x1d   :  { %p186_p1 = pnand %p185_p0, %p179_p11 }
  0x1f   :  { %189 = shalt.err (!%p186_p1)
}
  0x20   :  { %36 = dma.hbm_to_vmem [thread:$0]  %s248_s1, 256, %s34_s12, [#allocation6]  }
  0x21   :  { %190 = dma.done.wait [#allocation4], 256  }
  0x22   :  { %191 = vsyncadd [#allocation4], 4294967040 }
  0x23   :  { %192 = dma.done.wait [#allocation6], 256  }
  0x24   :  { %193 = vsyncadd [#allocation6], 4294967040  ;;  %v78_v0 = vlaneseq  ;;  %v196_v1 = vmov 1983009808   ;;  %v55_v5 = vld [vmem:[#allocation3] sm:$0xff]  ;;  %v56_v6 = vld [vmem:[#allocation3 + $0x8] sm:$0xff] }
  0x25   :  { %v76_v2 = vunpack.c.l.s4 %v196_v1  ;;  %v57_v7 = vld [vmem:[#allocation5] sm:$0xff]  ;;  %v58_v8 = vld [vmem:[#allocation5 + $0x8] sm:$0xff]  ;;  %vm116_vm0 = vcmask 1041408   ;;  %vm135_vm1 = vcmask 1024  }
  0x26   :  { %v79_v4 = vshrl.u32 %v78_v0, 7  ;;  %v59_v9 = vsub.f32 %v55_v5, %v57_v7  ;;  %v60_v11 = vsub.f32 %v56_v6, %v58_v8 }
  0x27   :  { %v77_v3 = vunpack.c.0.s8 %v76_v2 }
  0x28   :  { %v61_v12 = vmul.f32 %v59_v9, %v59_v9  ;;  %v62_v13 = vmul.f32 %v60_v11, %v60_v11 }
  0x29   :  { %v80_v10 = vsub.s32 %v77_v3, %v79_v4 }
  0x2a   :  { %v74_v14 = vcombine.high %v61_v12, %v61_v12  ;;  %v91_v16 = vcombine.high %v62_v13, %v62_v13 }
  0x2b   :  { %v81_v15 = vrot.slane %v61_v12, %v80_v10  ;;  %v98_v19 = vrot.slane %v62_v13, %v80_v10 }
  0x2c   :  { %v88_v17 = vrot.slane %v74_v14, %v80_v10  ;;  %v105_v25 = vrot.slane %v91_v16, %v80_v10 }
  0x2d   :  { %v89_v18 = vcombine.high %v81_v15, %v81_v15  ;;  %v117_v20 = vsel %vm116_vm0, %v81_v15, 0.0  ;;  %v106_v26 = vcombine.high %v98_v19, %v98_v19  ;;  %v124_v29 = vsel %vm116_vm0, %v98_v19, 0.0 }
  0x2e   :  { %v90_v21 = vcombine.high %v88_v17, %v88_v17  ;;  %v120_v23 = vsel %vm116_vm0, %v88_v17, 0.0  ;;  %v107_v31 = vcombine.high %v105_v25, %v105_v25  ;;  %v128_v34 = vsel %vm116_vm0, %v105_v25, 0.0 }
  0x2f   :  { %v118_v22 = vsel %vm116_vm0, %v89_v18, 0.0  ;;  %v126_v32 = vsel %vm116_vm0, %v106_v26, 0.0 }
  0x30   :  { %v119_v24 = vadd.f32 %v118_v22, %v117_v20  ;;  %v122_v27 = vsel %vm116_vm0, %v90_v21, 0.0  ;;  %v130_v36 = vsel %vm116_vm0, %v107_v31, 0.0 }
  0x32   :  { %v121_v28 = vadd.f32 %v120_v23, %v119_v24 }
  0x34   :  { %v123_v30 = vadd.f32 %v122_v27, %v121_v28 }
  0x36   :  { %v125_v33 = vadd.f32 %v124_v29, %v123_v30 }
  0x38   :  { %v127_v35 = vadd.f32 %v126_v32, %v125_v33 }
  0x3a   :  { %v129_v37 = vadd.f32 %v128_v34, %v127_v35 }
  0x3c   :  { %v131_v38 = vadd.f32 %v130_v36, %v129_v37 }
  0x3e   :  { %132 = vadd.xlane.f32.xlu0 %v131_v38 }
  0xcb   :  { %v133_v39 = vpop.xlane.xlu0 %132 }
  0xcc   :  { %v134_v40 = vmul.f32 0.0009765625, %v133_v39 }
  0xce   :  { %136 = vst.msk [vmem:[%s249_s2] sm:$0x3] %vm135_vm1, %v134_v40 }
  0xcf   :  { %141 = vsyncpa [#allocation4], 1 }
  0xd0   :  { %142 = vsyncpa [#allocation6], 1 }

</bundles_post_ra>
